<compile_context>
chip_gen: v5e
topology: v5e:2x2
jax: 0.10.0
libtpu: 0.0.40
codegen_flags: <defaults>
</compile_context>

<pallas_src>
import numpy as np

import jax
import jax.numpy as jnp
from jax.experimental import pallas as pl
from jax.experimental.pallas import tpu as pltpu


# --------------------------------------------------------------------------- #
# Kernel body
# --------------------------------------------------------------------------- #
def make_msa_kernel(batch_block, n_seq, d, h, mm_dtype, approx_recip, fused_layout):
    dh = d // h

    def msa_kernel(x_ref, wqkv_ref, bqkv_ref, o_ref):
        Bb = batch_block

        # ---- Fused QKV projection: one MXU pass over the whole (Bb*N, d) slab.
        # The 1/sqrt(dh) attention scale is already folded into W_q / b_q.
        x2 = x_ref[...].reshape(Bb * n_seq, d).astype(mm_dtype)       # leading merge only
        qkv = jnp.dot(x2, wqkv_ref[...],
                      preferred_element_type=jnp.float32) + bqkv_ref[...]   # (Bb*N, 3d) f32

        if fused_layout:
            # ---- Head split with a single relayout (transpose); the surrounding
            # reshapes are leading-dim splits.  z = head*Bb + batch.
            qkv = qkv.reshape(Bb * n_seq, 3 * h, dh)
            qkv = jnp.transpose(qkv, (1, 0, 2))                       # (3h, Bb*N, dh)
            qkv = qkv.reshape(3, h * Bb, n_seq, dh)                   # leading split (free)
            qh, kh, vh = qkv[0], qkv[1], qkv[2]                       # (h*Bb, N, dh) each
        else:
            # Proven fallback layout: per-head lane slices + axis-0 concat.
            qkv = qkv.reshape(Bb, n_seq, 3 * d)

            def heads(base):
                return jnp.concatenate(
                    [qkv[:, :, base + i * dh: base + (i + 1) * dh] for i in range(h)],
                    axis=0)

            qh, kh, vh = heads(0), heads(d), heads(2 * d)

        # ---- Batched attention over all (head, batch) pairs at once.  MXU operands
        # in mm_dtype, accumulation + softmax in f32 (VPU/EUP path).
        s = jnp.einsum('znd,zmd->znm', qh.astype(mm_dtype), kh.astype(mm_dtype),
                       preferred_element_type=jnp.float32)            # (h*Bb, N, N)
        s = s - jnp.max(s, axis=-1, keepdims=True)
        p = jnp.exp(s)
        l = jnp.sum(p, axis=-1, keepdims=True)                        # (h*Bb, N, 1)
        ov = jnp.einsum('znm,zmd->znd', p.astype(mm_dtype), vh.astype(mm_dtype),
                        preferred_element_type=jnp.float32)           # (h*Bb, N, dh)
        # Normalize after the small matmul; approx reciprocal lowers to the EUP slot.
        ov = ov * pl.reciprocal(l, approx=approx_recip)

        if fused_layout:
            # ---- Head merge with one relayout, then a lane-dense (N*d >= 128) store.
            out = jnp.transpose(ov.reshape(h, Bb, n_seq, dh), (1, 2, 0, 3))  # (Bb,N,h,dh)
            o_ref[...] = out.reshape(Bb, 1, n_seq * d).astype(o_ref.dtype)
        else:
            out = jnp.concatenate([ov[i * Bb:(i + 1) * Bb] for i in range(h)], axis=-1)
            o_ref[...] = out.astype(o_ref.dtype)                      # (Bb, N, d)

    return msa_kernel


# --------------------------------------------------------------------------- #
# Host-side weight packing
# --------------------------------------------------------------------------- #
def pack_qkv_weights(wq, bq, wk, bk, wv, bv):
    """Pack per-head nn.Linear params into one fused (d, 3d) matrix.

    Each head's W (out, in) is transposed and placed on the diagonal of a (d, d)
    block-diagonal matrix so x @ W_bd reproduces the per-head s @ W.T (each head
    reads only its own d_head slice of x, matching the PyTorch module).  The
    1/sqrt(d_head) attention scale is folded into the Q block and bias.
    """
    h, dh, _ = wq.shape
    d = h * dh
    scale = 1.0 / (dh ** 0.5)
    eye = jnp.eye(h, dtype=wq.dtype)

    def block_diag_t(w):
        # out[i*dh + a, j*dh + b] = eye[i, j] * w[i, b, a]   (w[i].T on block (i, i))
        return jnp.einsum('ij,iba->iajb', eye, w).reshape(d, d)

    w_qkv = jnp.concatenate(
        [block_diag_t(wq) * scale, block_diag_t(wk), block_diag_t(wv)], axis=1)  # (d, 3d)
    b_qkv = jnp.concatenate(
        [bq.reshape(-1) * scale, bk.reshape(-1), bv.reshape(-1)])[None, :]        # (1, 3d)
    return w_qkv, b_qkv


# --------------------------------------------------------------------------- #
# VMEM budgeting / batch_block selection
# --------------------------------------------------------------------------- #
def _vmem_step_bytes(batch_block, n_seq, d, h, mm_itemsize):
    f32 = 4
    rows = batch_block * n_seq
    io = 4 * rows * d * f32                                     # double-buffered in/out blocks
    weights = 2 * (d * 3 * d * mm_itemsize + 3 * d * f32)       # W_qkv / b_qkv buffers
    acts = rows * 3 * d * (f32 + mm_itemsize)                   # qkv slab (+ casts)
    acts += 5 * rows * d * f32                                  # q/k/v, ov, out
    scores = 2 * h * batch_block * n_seq * n_seq * f32          # s and p
    return io + weights + acts + scores


def _pick_batch_block(B, n_seq, d, h, mm_itemsize, budget_bytes=24 << 20):
    divisors = [x for x in range(1, B + 1) if B % x == 0]
    fits = [x for x in divisors if _vmem_step_bytes(x, n_seq, d, h, mm_itemsize) <= budget_bytes]
    if not fits:
        fits = [1]
    # Prefer the largest block that still leaves >= 2 grid steps (pipelining + the
    # second TensorCore on v7x); otherwise take the largest block that fits.
    multi = [x for x in fits if B // x >= 2]
    return max(multi) if multi else max(fits)


# --------------------------------------------------------------------------- #
# pallas_call wrapper
# --------------------------------------------------------------------------- #
def _msa_pallas(seqs, w_qkv, b_qkv, *, batch_block, h, fused_layout, mm_dtype,
                approx_recip, vmem_limit_bytes, cost):
    B, N, d = seqs.shape
    num_blocks = B // batch_block
    kernel = make_msa_kernel(batch_block, N, d, h, mm_dtype, approx_recip, fused_layout)

    if fused_layout:
        out_shape = jax.ShapeDtypeStruct((B, 1, N * d), seqs.dtype)   # lane-dense store
        out_spec = pl.BlockSpec((batch_block, 1, N * d), lambda b: (b, 0, 0))
    else:
        out_shape = jax.ShapeDtypeStruct((B, N, d), seqs.dtype)
        out_spec = pl.BlockSpec((batch_block, N, d), lambda b: (b, 0, 0))

    out = pl.pallas_call(
        kernel,
        out_shape=out_shape,
        grid_spec=pltpu.PrefetchScalarGridSpec(
            num_scalar_prefetch=0,
            grid=(num_blocks,),
            in_specs=[
                pl.BlockSpec((batch_block, N, d), lambda b: (b, 0, 0)),   # seqs block
                pl.BlockSpec((d, 3 * d), lambda b: (0, 0)),               # fused W_qkv
                pl.BlockSpec((1, 3 * d), lambda b: (0, 0)),               # fused b_qkv
            ],
            out_specs=out_spec,
        ),
        compiler_params=pltpu.CompilerParams(
            dimension_semantics=("parallel",),
            vmem_limit_bytes=vmem_limit_bytes),
        cost_estimate=cost,
    )(seqs, w_qkv, b_qkv)
    return out.reshape(B, N, d)


def msa_forward(seqs, wq, bq, wk, bk, wv, bv, *, batch_block=None,
                matmul_dtype=jnp.float32, head_layout="auto"):
    B, N, d = seqs.shape
    h, dh, _ = wq.shape
    assert d == h * dh

    mm_dtype = np.dtype(matmul_dtype)
    approx_recip = bool(mm_dtype != np.dtype(jnp.float32))

    if batch_block is None:
        batch_block = _pick_batch_block(B, N, d, h, mm_dtype.itemsize)
    assert B % batch_block == 0

    w_qkv, b_qkv = pack_qkv_weights(wq, bq, wk, bk, wv, bv)
    w_qkv = w_qkv.astype(mm_dtype)            # half-size weight DMA on the bf16 path

    flops = 2 * B * N * d * (3 * d) + 4 * B * h * N * N * dh   # proj + scores + p@v
    bytes_accessed = int(seqs.size * seqs.dtype.itemsize + w_qkv.size * mm_dtype.itemsize
                         + b_qkv.size * 4 + B * N * d * seqs.dtype.itemsize)
    cost = pl.CostEstimate(flops=flops, transcendentals=B * h * N * N,
                           bytes_accessed=bytes_accessed)

    est = _vmem_step_bytes(batch_block, N, d, h, mm_dtype.itemsize)
    vmem_limit = int(min(48 << 20, max(32 << 20, 2 * est)))

    def run(fused):
        return _msa_pallas(seqs, w_qkv, b_qkv, batch_block=batch_block, h=h,
                           fused_layout=fused, mm_dtype=mm_dtype,
                           approx_recip=approx_recip, vmem_limit_bytes=vmem_limit,
                           cost=cost)

    if head_layout == "concat":
        return run(False)
    if head_layout == "fused":
        return run(True)
    # "auto": prefer the single-relayout / lane-dense-store layout; if this Mosaic
    # build rejects the in-kernel reshape/transpose relayout, fall back to the
    # proven slice+concat layout so the kernel always runs.
    try:
        return run(True)
    except Exception:
        return run(False)


# --------------------------------------------------------------------------- #
# Pure-JAX reference mirroring the PyTorch loop semantics
# --------------------------------------------------------------------------- #
def msa_reference(seqs, wq, bq, wk, bk, wv, bv):
    B, N, d = seqs.shape
    h, dh, _ = wq.shape
    outs = []
    for b in range(B):
        x = seqs[b]
        heads = []
        for head in range(h):
            s = x[:, head * dh:(head + 1) * dh]
            q = s @ wq[head].T + bq[head]
            k = s @ wk[head].T + bk[head]
            v = s @ wv[head].T + bv[head]
            a = jax.nn.softmax(q @ k.T / (dh ** 0.5), axis=-1)
            heads.append(a @ v)
        outs.append(jnp.concatenate(heads, axis=-1))
    return jnp.stack(outs, axis=0)


if __name__ == "__main__":
    # Shapes consistent with the module: d=32 hidden, h=4 heads, seq N=8, batch B=2.
    B, N, d, h = 2, 8, 32, 4
    d_head = d // h

    key = jax.random.PRNGKey(0)
    ks = jax.random.split(key, 7)
    seqs = jax.random.normal(ks[0], (B, N, d), dtype=jnp.float32)

    init = lambda k, shape: (jax.random.uniform(k, shape, jnp.float32) - 0.5) * (2.0 / (d_head ** 0.5))
    wq = init(ks[1], (h, d_head, d_head))
    bq = init(ks[2], (h, d_head))
    wk = init(ks[3], (h, d_head, d_head))
    bk = init(ks[4], (h, d_head))
    wv = init(ks[5], (h, d_head, d_head))
    bv = init(ks[6], (h, d_head))

    ref = msa_reference(seqs, wq, bq, wk, bk, wv, bv)

    # f32 MXU path (default): bit-comparable to the exact-softmax reference.
    out_f32 = jax.block_until_ready(msa_forward(seqs, wq, bq, wk, bk, wv, bv))
    assert out_f32.shape == (B, N, d)
    assert jnp.allclose(out_f32, ref, atol=1e-5, rtol=1e-5), "f32 kernel mismatch vs reference"

    # bf16 MXU operands (v6e/v7x fast path), f32 accumulation + f32 softmax.
    out_bf16 = jax.block_until_ready(
        msa_forward(seqs, wq, bq, wk, bk, wv, bv, matmul_dtype=jnp.bfloat16))
    assert jnp.allclose(out_bf16, ref, atol=5e-2, rtol=5e-2), "bf16 kernel mismatch vs reference"

    print("KERNEL_OK")
</pallas_src>

<mosaic_0001>
module attributes {stable_mosaic.version = 11 : i64} {
  func.func @msa_kernel(%arg0: i32, %arg1: memref<1x8x32xf32, #tpu.memory_space<vmem>>, %arg2: memref<32x96xf32, #tpu.memory_space<vmem>>, %arg3: memref<1x96xf32, #tpu.memory_space<vmem>>, %arg4: memref<1x1x256xf32, #tpu.memory_space<vmem>>) attributes {dimension_semantics = [#tpu.dimension_semantics<parallel>], iteration_bounds = array<i64: 2>, scalar_prefetch = 0 : i64, scratch_operands = 0 : i64, tpu.core_type = #tpu.core_type<tc>, window_params = [{transform_indices = @transform_0, window_bounds = array<i64: 1, 8, 32>}, {pipeline_mode = #tpu.pipeline_mode<synchronous>, transform_indices = @transform_1, window_bounds = array<i64: 32, 96>}, {pipeline_mode = #tpu.pipeline_mode<synchronous>, transform_indices = @transform_2, window_bounds = array<i64: 1, 96>}, {transform_indices = @transform_3, window_bounds = array<i64: 1, 1, 256>}]} {
    %c0 = arith.constant 0 : index
    %c0_0 = arith.constant 0 : index
    %c0_1 = arith.constant 0 : index
    %0 = vector.load %arg1[%c0, %c0_0, %c0_1] : memref<1x8x32xf32, #tpu.memory_space<vmem>>, vector<1x8x32xf32>
    %1 = vector.shape_cast %0 : vector<1x8x32xf32> to vector<8x32xf32>
    %c0_2 = arith.constant 0 : index
    %c0_3 = arith.constant 0 : index
    %2 = vector.load %arg2[%c0_2, %c0_3] : memref<32x96xf32, #tpu.memory_space<vmem>>, vector<32x96xf32>
    %cst = arith.constant dense<0.000000e+00> : vector<8x96xf32>
    %3 = tpu.matmul %1, %2, %cst {dimension_numbers = #tpu.dot_dimension_numbers<[1], [0], [0], [1], [0, 0, 1, 1], [], []>} : vector<8x32xf32>, vector<32x96xf32>, vector<8x96xf32> -> vector<8x96xf32>
    %c0_4 = arith.constant 0 : index
    %c0_5 = arith.constant 0 : index
    %4 = vector.load %arg3[%c0_4, %c0_5] : memref<1x96xf32, #tpu.memory_space<vmem>>, vector<1x96xf32>
    %5 = vector.broadcast %4 : vector<1x96xf32> to vector<8x96xf32>
    %6 = arith.addf %3, %5 : vector<8x96xf32>
    %7 = vector.shape_cast %6 : vector<8x96xf32> to vector<8x12x8xf32>
    %8 = tpu.transpose %7, [1, 0, 2] : vector<8x12x8xf32> -> vector<12x8x8xf32>
    %9 = vector.shape_cast %8 : vector<12x8x8xf32> to vector<3x4x8x8xf32>
    %10 = vector.extract_strided_slice %9 {offsets = [0, 0, 0, 0], sizes = [1, 4, 8, 8], strides = [1, 1, 1, 1]} : vector<3x4x8x8xf32> to vector<1x4x8x8xf32>
    %11 = vector.shape_cast %10 : vector<1x4x8x8xf32> to vector<4x8x8xf32>
    %12 = vector.extract_strided_slice %9 {offsets = [1, 0, 0, 0], sizes = [1, 4, 8, 8], strides = [1, 1, 1, 1]} : vector<3x4x8x8xf32> to vector<1x4x8x8xf32>
    %13 = vector.shape_cast %12 : vector<1x4x8x8xf32> to vector<4x8x8xf32>
    %14 = vector.extract_strided_slice %9 {offsets = [2, 0, 0, 0], sizes = [1, 4, 8, 8], strides = [1, 1, 1, 1]} : vector<3x4x8x8xf32> to vector<1x4x8x8xf32>
    %15 = vector.shape_cast %14 : vector<1x4x8x8xf32> to vector<4x8x8xf32>
    "tpu.trace_start"() <{level = 10 : i32, message = "znd,zmd->znm"}> : () -> ()
    %cst_6 = arith.constant dense<0.000000e+00> : vector<4x8x8xf32>
    %16 = tpu.matmul %11, %13, %cst_6 {dimension_numbers = #tpu.dot_dimension_numbers<[2], [2], [1], [1], [0, 0, 0, 1, 1, 1], [0], [0]>} : vector<4x8x8xf32>, vector<4x8x8xf32>, vector<4x8x8xf32> -> vector<4x8x8xf32>
    "tpu.trace_stop"() : () -> ()
    %cst_7 = arith.constant dense<0xFF800000> : vector<4x8xf32>
    %17 = vector.multi_reduction <maximumf>, %16, %cst_7 [2] : vector<4x8x8xf32> to vector<4x8xf32>
    %18 = vector.shape_cast %17 : vector<4x8xf32> to vector<4x8x1xf32>
    %19 = vector.broadcast %18 : vector<4x8x1xf32> to vector<4x8x8xf32>
    %20 = arith.subf %16, %19 : vector<4x8x8xf32>
    %21 = math.exp %20 : vector<4x8x8xf32>
    %cst_8 = arith.constant dense<0.000000e+00> : vector<4x8xf32>
    %22 = vector.multi_reduction <add>, %21, %cst_8 [2] : vector<4x8x8xf32> to vector<4x8xf32>
    %23 = vector.shape_cast %22 : vector<4x8xf32> to vector<4x8x1xf32>
    "tpu.trace_start"() <{level = 10 : i32, message = "znm,zmd->znd"}> : () -> ()
    %cst_9 = arith.constant dense<0.000000e+00> : vector<4x8x8xf32>
    %24 = tpu.matmul %21, %15, %cst_9 {dimension_numbers = #tpu.dot_dimension_numbers<[2], [1], [1], [2], [0, 0, 0, 1, 1, 2], [0], [0]>} : vector<4x8x8xf32>, vector<4x8x8xf32>, vector<4x8x8xf32> -> vector<4x8x8xf32>
    "tpu.trace_stop"() : () -> ()
    %25 = tpu.reciprocal %23 : vector<4x8x1xf32> -> vector<4x8x1xf32>
    %26 = vector.broadcast %25 : vector<4x8x1xf32> to vector<4x8x8xf32>
    %27 = arith.mulf %24, %26 : vector<4x8x8xf32>
    %28 = vector.shape_cast %27 : vector<4x8x8xf32> to vector<4x1x8x8xf32>
    %29 = tpu.transpose %28, [1, 2, 0, 3] : vector<4x1x8x8xf32> -> vector<1x8x4x8xf32>
    %30 = vector.shape_cast %29 : vector<1x8x4x8xf32> to vector<1x1x256xf32>
    %c0_10 = arith.constant 0 : index
    %c0_11 = arith.constant 0 : index
    %c0_12 = arith.constant 0 : index
    %31 = vector.load %arg4[%c0_10, %c0_11, %c0_12] : memref<1x1x256xf32, #tpu.memory_space<vmem>>, vector<1x1x256xf32>
    tpu.vector_store %arg4[%c0_10, %c0_11, %c0_12], %30 {strides = array<i32>} : memref<1x1x256xf32, #tpu.memory_space<vmem>>, vector<1x1x256xf32>,
    return
  }
  func.func @transform_0(%arg0: i32) -> (i32, i32, i32) {
    %c0_i32 = arith.constant 0 : i32
    %c0_i32_0 = arith.constant 0 : i32
    %c0_i32_1 = arith.constant 0 : i32
    return %arg0, %c0_i32, %c0_i32_0 : i32, i32, i32
  }
  func.func @transform_1(%arg0: i32) -> (i32, i32) {
    %c0_i32 = arith.constant 0 : i32
    %c0_i32_0 = arith.constant 0 : i32
    %c0_i32_1 = arith.constant 0 : i32
    return %c0_i32, %c0_i32_0 : i32, i32
  }
  func.func @transform_2(%arg0: i32) -> (i32, i32) {
    %c0_i32 = arith.constant 0 : i32
    %c0_i32_0 = arith.constant 0 : i32
    %c0_i32_1 = arith.constant 0 : i32
    return %c0_i32, %c0_i32_0 : i32, i32
  }
  func.func @transform_3(%arg0: i32) -> (i32, i32, i32) {
    %c0_i32 = arith.constant 0 : i32
    %c0_i32_0 = arith.constant 0 : i32
    %c0_i32_1 = arith.constant 0 : i32
    return %arg0, %c0_i32, %c0_i32_0 : i32, i32, i32
  }
}

module attributes {stable_mosaic.version = 11 : i64} {
  func.func @msa_kernel(%arg0: i32, %arg1: memref<1x8x32xf32, #tpu.memory_space<vmem>>, %arg2: memref<32x96xf32, #tpu.memory_space<vmem>>, %arg3: memref<1x96xf32, #tpu.memory_space<vmem>>, %arg4: memref<1x8x32xf32, #tpu.memory_space<vmem>>) attributes {dimension_semantics = [#tpu.dimension_semantics<parallel>], iteration_bounds = array<i64: 2>, scalar_prefetch = 0 : i64, scratch_operands = 0 : i64, tpu.core_type = #tpu.core_type<tc>, window_params = [{transform_indices = @transform_0, window_bounds = array<i64: 1, 8, 32>}, {pipeline_mode = #tpu.pipeline_mode<synchronous>, transform_indices = @transform_1, window_bounds = array<i64: 32, 96>}, {pipeline_mode = #tpu.pipeline_mode<synchronous>, transform_indices = @transform_2, window_bounds = array<i64: 1, 96>}, {transform_indices = @transform_3, window_bounds = array<i64: 1, 8, 32>}]} {
    %c0 = arith.constant 0 : index
    %c0_0 = arith.constant 0 : index
    %c0_1 = arith.constant 0 : index
    %0 = vector.load %arg1[%c0, %c0_0, %c0_1] : memref<1x8x32xf32, #tpu.memory_space<vmem>>, vector<1x8x32xf32>
    %1 = vector.shape_cast %0 : vector<1x8x32xf32> to vector<8x32xf32>
    %c0_2 = arith.constant 0 : index
    %c0_3 = arith.constant 0 : index
    %2 = vector.load %arg2[%c0_2, %c0_3] : memref<32x96xf32, #tpu.memory_space<vmem>>, vector<32x96xf32>
    %cst = arith.constant dense<0.000000e+00> : vector<8x96xf32>
    %3 = tpu.matmul %1, %2, %cst {dimension_numbers = #tpu.dot_dimension_numbers<[1], [0], [0], [1], [0, 0, 1, 1], [], []>} : vector<8x32xf32>, vector<32x96xf32>, vector<8x96xf32> -> vector<8x96xf32>
    %c0_4 = arith.constant 0 : index
    %c0_5 = arith.constant 0 : index
    %4 = vector.load %arg3[%c0_4, %c0_5] : memref<1x96xf32, #tpu.memory_space<vmem>>, vector<1x96xf32>
    %5 = vector.broadcast %4 : vector<1x96xf32> to vector<8x96xf32>
    %6 = arith.addf %3, %5 : vector<8x96xf32>
    %7 = vector.shape_cast %6 : vector<8x96xf32> to vector<1x8x96xf32>
    %8 = vector.extract_strided_slice %7 {offsets = [0, 0, 0], sizes = [1, 8, 8], strides = [1, 1, 1]} : vector<1x8x96xf32> to vector<1x8x8xf32>
    %9 = vector.extract_strided_slice %7 {offsets = [0, 0, 8], sizes = [1, 8, 8], strides = [1, 1, 1]} : vector<1x8x96xf32> to vector<1x8x8xf32>
    %10 = vector.extract_strided_slice %7 {offsets = [0, 0, 16], sizes = [1, 8, 8], strides = [1, 1, 1]} : vector<1x8x96xf32> to vector<1x8x8xf32>
    %11 = vector.extract_strided_slice %7 {offsets = [0, 0, 24], sizes = [1, 8, 8], strides = [1, 1, 1]} : vector<1x8x96xf32> to vector<1x8x8xf32>
    %12 = tpu.concatenate %8, %9, %10, %11 in 0 : vector<1x8x8xf32>, vector<1x8x8xf32>, vector<1x8x8xf32>, vector<1x8x8xf32> -> vector<4x8x8xf32>
    %13 = vector.extract_strided_slice %7 {offsets = [0, 0, 32], sizes = [1, 8, 8], strides = [1, 1, 1]} : vector<1x8x96xf32> to vector<1x8x8xf32>
    %14 = vector.extract_strided_slice %7 {offsets = [0, 0, 40], sizes = [1, 8, 8], strides = [1, 1, 1]} : vector<1x8x96xf32> to vector<1x8x8xf32>
    %15 = vector.extract_strided_slice %7 {offsets = [0, 0, 48], sizes = [1, 8, 8], strides = [1, 1, 1]} : vector<1x8x96xf32> to vector<1x8x8xf32>
    %16 = vector.extract_strided_slice %7 {offsets = [0, 0, 56], sizes = [1, 8, 8], strides = [1, 1, 1]} : vector<1x8x96xf32> to vector<1x8x8xf32>
    %17 = tpu.concatenate %13, %14, %15, %16 in 0 : vector<1x8x8xf32>, vector<1x8x8xf32>, vector<1x8x8xf32>, vector<1x8x8xf32> -> vector<4x8x8xf32>
    %18 = vector.extract_strided_slice %7 {offsets = [0, 0, 64], sizes = [1, 8, 8], strides = [1, 1, 1]} : vector<1x8x96xf32> to vector<1x8x8xf32>
    %19 = vector.extract_strided_slice %7 {offsets = [0, 0, 72], sizes = [1, 8, 8], strides = [1, 1, 1]} : vector<1x8x96xf32> to vector<1x8x8xf32>
    %20 = vector.extract_strided_slice %7 {offsets = [0, 0, 80], sizes = [1, 8, 8], strides = [1, 1, 1]} : vector<1x8x96xf32> to vector<1x8x8xf32>
    %21 = vector.extract_strided_slice %7 {offsets = [0, 0, 88], sizes = [1, 8, 8], strides = [1, 1, 1]} : vector<1x8x96xf32> to vector<1x8x8xf32>
    %22 = tpu.concatenate %18, %19, %20, %21 in 0 : vector<1x8x8xf32>, vector<1x8x8xf32>, vector<1x8x8xf32>, vector<1x8x8xf32> -> vector<4x8x8xf32>
    "tpu.trace_start"() <{level = 10 : i32, message = "znd,zmd->znm"}> : () -> ()
    %cst_6 = arith.constant dense<0.000000e+00> : vector<4x8x8xf32>
    %23 = tpu.matmul %12, %17, %cst_6 {dimension_numbers = #tpu.dot_dimension_numbers<[2], [2], [1], [1], [0, 0, 0, 1, 1, 1], [0], [0]>} : vector<4x8x8xf32>, vector<4x8x8xf32>, vector<4x8x8xf32> -> vector<4x8x8xf32>
    "tpu.trace_stop"() : () -> ()
    %cst_7 = arith.constant dense<0xFF800000> : vector<4x8xf32>
    %24 = vector.multi_reduction <maximumf>, %23, %cst_7 [2] : vector<4x8x8xf32> to vector<4x8xf32>
    %25 = vector.shape_cast %24 : vector<4x8xf32> to vector<4x8x1xf32>
    %26 = vector.broadcast %25 : vector<4x8x1xf32> to vector<4x8x8xf32>
    %27 = arith.subf %23, %26 : vector<4x8x8xf32>
    %28 = math.exp %27 : vector<4x8x8xf32>
    %cst_8 = arith.constant dense<0.000000e+00> : vector<4x8xf32>
    %29 = vector.multi_reduction <add>, %28, %cst_8 [2] : vector<4x8x8xf32> to vector<4x8xf32>
    %30 = vector.shape_cast %29 : vector<4x8xf32> to vector<4x8x1xf32>
    "tpu.trace_start"() <{level = 10 : i32, message = "znm,zmd->znd"}> : () -> ()
    %cst_9 = arith.constant dense<0.000000e+00> : vector<4x8x8xf32>
    %31 = tpu.matmul %28, %22, %cst_9 {dimension_numbers = #tpu.dot_dimension_numbers<[2], [1], [1], [2], [0, 0, 0, 1, 1, 2], [0], [0]>} : vector<4x8x8xf32>, vector<4x8x8xf32>, vector<4x8x8xf32> -> vector<4x8x8xf32>
    "tpu.trace_stop"() : () -> ()
    %32 = tpu.reciprocal %30 : vector<4x8x1xf32> -> vector<4x8x1xf32>
    %33 = vector.broadcast %32 : vector<4x8x1xf32> to vector<4x8x8xf32>
    %34 = arith.mulf %31, %33 : vector<4x8x8xf32>
    %35 = vector.extract_strided_slice %34 {offsets = [0, 0, 0], sizes = [1, 8, 8], strides = [1, 1, 1]} : vector<4x8x8xf32> to vector<1x8x8xf32>
    %36 = vector.extract_strided_slice %34 {offsets = [1, 0, 0], sizes = [1, 8, 8], strides = [1, 1, 1]} : vector<4x8x8xf32> to vector<1x8x8xf32>
    %37 = vector.extract_strided_slice %34 {offsets = [2, 0, 0], sizes = [1, 8, 8], strides = [1, 1, 1]} : vector<4x8x8xf32> to vector<1x8x8xf32>
    %38 = vector.extract_strided_slice %34 {offsets = [3, 0, 0], sizes = [1, 8, 8], strides = [1, 1, 1]} : vector<4x8x8xf32> to vector<1x8x8xf32>
    %39 = tpu.concatenate %35, %36, %37, %38 in 2 : vector<1x8x8xf32>, vector<1x8x8xf32>, vector<1x8x8xf32>, vector<1x8x8xf32> -> vector<1x8x32xf32>
    %c0_10 = arith.constant 0 : index
    %c0_11 = arith.constant 0 : index
    %c0_12 = arith.constant 0 : index
    %40 = vector.load %arg4[%c0_10, %c0_11, %c0_12] : memref<1x8x32xf32, #tpu.memory_space<vmem>>, vector<1x8x32xf32>
    tpu.vector_store %arg4[%c0_10, %c0_11, %c0_12], %39 {strides = array<i32>} : memref<1x8x32xf32, #tpu.memory_space<vmem>>, vector<1x8x32xf32>,
    return
  }
  func.func @transform_0(%arg0: i32) -> (i32, i32, i32) {
    %c0_i32 = arith.constant 0 : i32
    %c0_i32_0 = arith.constant 0 : i32
    %c0_i32_1 = arith.constant 0 : i32
    return %arg0, %c0_i32, %c0_i32_0 : i32, i32, i32
  }
  func.func @transform_1(%arg0: i32) -> (i32, i32) {
    %c0_i32 = arith.constant 0 : i32
    %c0_i32_0 = arith.constant 0 : i32
    %c0_i32_1 = arith.constant 0 : i32
    return %c0_i32, %c0_i32_0 : i32, i32
  }
  func.func @transform_2(%arg0: i32) -> (i32, i32) {
    %c0_i32 = arith.constant 0 : i32
    %c0_i32_0 = arith.constant 0 : i32
    %c0_i32_1 = arith.constant 0 : i32
    return %c0_i32, %c0_i32_0 : i32, i32
  }
  func.func @transform_3(%arg0: i32) -> (i32, i32, i32) {
    %c0_i32 = arith.constant 0 : i32
    %c0_i32_0 = arith.constant 0 : i32
    %c0_i32_1 = arith.constant 0 : i32
    return %arg0, %c0_i32, %c0_i32_0 : i32, i32, i32
  }
}

</mosaic_0001>

<bundles_post_ra>
// kernel: tpu_custom_call.1
= control target key start
LH: loop header
LB: loop body
LE: loop exit
PB: predicated region body
PF: predicated region fallthrough
CT: control target
= control target key end

     0   :  { %8 = vsyncpa [#allocation3], 0  ;;  %s1109_s0 = inlined_call_operand.hbm [shape: f32[2,8,32], index: 0, kind: input, shape index: {}]   ;;  %s1110_s1 = inlined_call_operand.hbm [shape: f32[32,96], index: 1, kind: input, shape index: {}]   ;;  %s1111_s2 = inlined_call_operand.vmem [shape: f32[1,96], index: 2, kind: input, shape index: {}]   ;;  %s1112_s3 = inlined_call_operand.hbm [shape: f32[2,8,32], index: 3, kind: output, shape index: {}]  }
   0x1   :  { %10 = vsyncpa [#allocation3 + $0x1], 0 }
   0x2   :  { %11 = vsyncpa [#allocation6], 0 }
   0x3   :  { %12 = vsyncpa [#allocation4], 0 }
   0x4   :  { %14 = vsyncpa [#allocation4 + $0x1], 0  ;;  %s943_s12 = smov 0   ;;  %s945_s13 = smov 0  }
   0x5   :  { %s947_s14 = smov 0   ;;  %s949_s15 = smov 0  }
   0x6 LB: > { %s130_s18 = sshll.u32 %s1110_s1, 4  ;;  %s967_s19 = sadd.s32 4294967295, %s910_s15   ;;  %s910_s15 = sphi %s949_s15, %s1122_s15   ;;  %s906_s14 = sphi %s947_s14, %s1121_s14   ;;  %s902_s13 = sphi %s945_s13, %s1120_s13   ;;  %s898_s12 = sphi %s943_s12, %s1119_s12   ;;  %s131_s18 = int_to_ptr.hbm [resolvable:$true] %s130_s18 }
   0x7   : > { %p665_p0 = scmp.ge.s32.totalorder %s910_s15, 1  ;;  %p41_p1 = scmp.eq.s32.totalorder %s967_s19, 0 }
   0x8   : > { %p119_p2 = scmp.lt.s32.totalorder %s910_s15, 3  ;;  %s912_s21 = smov [#allocation5]  }
   0x9   : > { %s132_s22 = sshll.u32 %s912_s21, 4  ;;  %s913_s23 = smov 128   ;;  %s133_s22 = int_to_ptr.vmem [resolvable:$true] %s132_s22 }
   0xa   : > { %p972_p3 = pnand %p665_p0, %p119_p2  ;;  %s914_s24 = smov 8  }
   0xb   : > { %s664_s25 = sadd.s32 4294967294, %s910_s15   ;;  %s983_s26 = sadd.s32 1, %s910_s15  }
   0xc   : > { %p699_p4 = pneg %p972_p3  ;;  %s27_s27 = sadd.s32 1, %s906_s14 }
   0xd   : > { %s24_s28 = ssub.s32 %s910_s15, %s983_s26  ;;  %p34_p7 = scmp.ne.s32.totalorder %s906_s14, %s902_s13 }
   0xe   : > { %p700_p6 = pnand %p699_p4, %p41_p1  ;;  %p25_p8 = scmp.eq.s32.totalorder %s24_s28, 0 }
   0xf   : > { %p35_p9 = scmp.eq.s32.totalorder %s910_s15, 0  ;;  %p40_p10 = scmp.ne.s32.totalorder %s902_s13, %s898_s12 }
  0x10   : > { %702 = dma.hbm_to_vmem [thread:$0]  (!%p700_p6), %s131_s18, 512, %s133_s22, [#allocation6], %s913_s23, %s913_s23, %s914_s24  }
  0x11   : > { %p106_p11 = scmp.eq.s32.totalorder %s967_s19, 1  ;;  %p999_p12 = por %p41_p1, %p40_p10 }
  0x12   : > { %s995_s29 = scalar_select %p25_p8, %s906_s14, %s27_s27  }
  0x13   : > { %p1003_p13 = por %p106_p11, %p34_p7  ;;  %p112_p0 = scmp.eq.s32.totalorder %s664_s25, 1 }
  0x14   : > { %p36_p2 = por %p35_p9, %p34_p7  ;;  %s149_s5 = sand.u32 1, %s906_s14  }
  0x15   : > { %p1008_p4 = por %p112_p0, %p40_p10  ;;  %p712_p6 = scmp.lt.s32.totalorder %s910_s15, 2 }
  0x16   : > { %s668_s7 = sshll.u32 %s149_s5, 3  ;;  %s669_s8 = sshll.u32 %s910_s15, 3 }
  0x17   : > { %s157_s11 = scalar_lea.hbm %s1109_s0, %s669_s8  ;;  %s153_s17 = scalar_lea.vmem [#allocation2], %s668_s7 }
  0x18   : > { %s159_s16 = sshll.u32 %s157_s11, 4  ;;  %s161_s18 = sshll.u32 %s153_s17, 4  ;;  %s160_s16 = int_to_ptr.hbm [resolvable:$true] %s159_s16  ;;  %s162_s18 = int_to_ptr.vmem [resolvable:$true] %s161_s18 }
  0x19   : > { %p1017_p8 = pnand %p712_p6, %p36_p2  ;;  %s150_s22 = scalar_lea.sflag [#allocation3], %s149_s5 }
  0x1a   : > { %s810_s23 = sshra.s32 %s160_s16, 4  ;;  %s817_s28 = scalar_lea.hbm %s1109_s0, 16  ;;  %s811_s23 = int_to_ptr.hbm [resolvable:$true] %s810_s23 }
  0x1b   : > { %s812_s24 = scalar_lea.hbm %s811_s23, 8  ;;  %p814_p9 = pneg %p1017_p8 }
  0x1c   : > { %p813_p7 = scmp.ne.s32.totalorder %s811_s23, %s812_s24  ;;  %p818_p0 = scmp.lt.s32.totalorder %s811_s23, %s1109_s0 }
  0x1d   : > { %p819_p2 = scmp.lt.s32.totalorder %s817_s28, %s812_s24 }
  0x1e   : > { %p815_p10 = pnand %p814_p9, %p813_p7 }
  0x1f   : > { %p820_p6 = por %p819_p2, %p818_p0 }
  0x20   : > { %p816_p11 = pneg %p815_p10 }
  0x22   : > { %p821_p5 = pnand %p820_p6, %p816_p11 }
  0x24   : > { %824 = shalt.err (!%p821_p5)
}
  0x25   : > { %706 = dma.hbm_to_vmem [thread:$0]  (!%p1017_p8), %s160_s16, 128, %s162_s18, %s150_s22  }
  0x26   : > { %170 = sbr.rel (%p972_p3) target bundleno = 939 (0x3ab), region = 32  ;;  %s1034_s5 = sand.u32 (!%p972_p3), 1, %s902_s13  }
  0x27   : > { %s671_s9 = sshll.u32 (!%p972_p3), %s1034_s5, 3  ;;  %s173_s10 = scalar_lea.sflag (!%p972_p3), [#allocation3], %s1034_s5 }
  0x28   : > { %s176_s11 = scalar_lea.vmem (!%p972_p3), [#allocation2], %s671_s9 }
  0x2b   : > { %885 = dma.done.wait (%p999_p12), %s173_s10, 128  }
  0x2c   : > { %887 = vsyncadd (%p999_p12), %s173_s10, 4294967168 }
  0x2d   : > { %889 = dma.done.wait (%p41_p1), [#allocation6], 512  }
  0x2e   : > { %891 = vsyncadd (%p41_p1), [#allocation6], 4294966784  ;;  %v209_v0 = vld [vmem:[#allocation5 + $0x18] sm:$0xff]  ;;  %v208_v1 = vld [vmem:[#allocation5 + $0x10] sm:$0xff]  ;;  %vm214_vm0 = vcmask 261120   ;;  %s915_s16 = smov 96  }
  0x2f   : > { %230 = vmatpush.msra.mxu0 %v209_v0  ;;  %v207_v2 = vld [vmem:[#allocation5 + $0x8] sm:$0xff]  ;;  %v206_v3 = vld [vmem:[#allocation5] sm:$0xff]  ;;  %v205_v4 = vld [vmem:[%s176_s11] sm:$0xff]  ;;  %s916_s17 = smov 104   ;;  %s917_s18 = smov 120   ;;  %vm247_vm1 = vcmask 64512  }
  0x30   : > { %v763_v5 = vld [vmem:[%s1111_s2] ss:$0 sm:$0xff]  ;;  %s918_s21 = smov 112   ;;  %s919_s22 = smov 64  }
  0x31   : > { %231 = vmatpush.msra.mxu0 %v208_v1  ;;  %s920_s23 = smov 8   ;;  %s921_s24 = smov 24  }
  0x32   : > { %s922_s25 = smov 16   ;;  %s688_s27 = sshll.u32 %s967_s19, 3 }
  0x33   : > { %232 = vmatpush.msra.mxu0 %v207_v2  ;;  %s579_s8 = scalar_lea.hbm %s1112_s3, %s688_s27  ;;  %s204_s10 = scalar_lea.vmem [#allocation7], %s671_s9 }
  0x34   : > { %s581_s11 = sshll.u32 %s204_s10, 4  ;;  %s583_s20 = sshll.u32 %s579_s8, 4  ;;  %s582_s11 = int_to_ptr.vmem [resolvable:$true] %s581_s11  ;;  %s584_s20 = int_to_ptr.hbm [resolvable:$true] %s583_s20 }
  0x35   : > { %233 = vmatpush.msra.mxu0 %v206_v3  ;;  %s569_s19 = scalar_lea.sflag [#allocation4], %s1034_s5  ;;  %s854_s30 = sshra.s32 %s584_s20, 4  ;;  %s855_s30 = int_to_ptr.hbm [resolvable:$true] %s854_s30 }
  0x36   : > { %674 = vmatmul.msk.f32.vlgmr.msra.gmra.mxu0 %vm214_vm0, %v205_v4  ;;  %p861_p12 = scmp.lt.s32.totalorder %s855_s30, %s1112_s3 }
  0xb3   : > { %v235_v6 = vpop.f32.mrf.mxu0 }
  0xb4   : > { %v236_v7 = vadd.f32 %v763_v5, %v235_v6 }
  0xb6   : > { %245 = vrot.lane.b32.xlu2 %v236_v7, %s915_s16  ;;  %243 = vrot.lane.b32.xlu1 %v236_v7, %s916_s17 }
  0xb7   : > { %239 = vrot.lane.b32.xlu0 %v236_v7, %s917_s18  ;;  %s860_s18 = scalar_lea.hbm %s1112_s3, 16 }
  0xbf   : > { %241 = vrot.lane.b32.xlu0 %v236_v7, %s918_s21 }
 0x110   : > { %v246_v8 = vpop.permute.xlu2 %245 }
 0x111   : > { %675 = vmatpush.xpose.msk.msra.mxu1 %vm247_vm1, %v246_v8 }
 0x114   : > { %676 = vmatmul.msk.f32.vlgmr.msra.gmra.mxu1 %vm247_vm1, %v236_v7 }
 0x128   : > { %v244_v9 = vpop.permute.xlu1 %243 }
 0x129   : > { %v240_v10 = vpop.permute.xlu0 %239  ;;  %324 = vrot.lane.b32.xlu0 %v244_v9, %s915_s16 }
 0x12a   : > { %272 = vrot.lane.b32.xlu1 %v240_v10, %s915_s16 }
 0x131   : > { %v242_v11 = vpop.permute.xlu0 %241 }
 0x132   : > { %298 = vrot.lane.b32.xlu2 %v242_v11, %s915_s16  ;;  %v758_v23 = vpack.i.bf16 %v244_v9, %v242_v11  ;;  %s856_s16 = scalar_lea.hbm %s855_s30, 8 }
 0x133   : > { %p857_p1 = scmp.ne.s32.totalorder %s855_s30, %s856_s16  ;;  %p862_p8 = scmp.lt.s32.totalorder %s860_s18, %s856_s16 }
 0x135   : > { %p858_p3 = pnand %p857_p1, %p1003_p13  ;;  %p863_p7 = por %p862_p8, %p861_p12 }
 0x137   : > { %p859_p5 = pneg %p858_p3 }
 0x139   : > { %p864_p9 = pnand %p863_p7, %p859_p5 }
 0x18c   : > { %v299_v12 = vpop.permute.xlu2 %298 }
 0x18d   : > { %679 = vmatpush.xpose.msk.msra.mxu3 %vm247_vm1, %v299_v12 }
 0x190   : > { %680 = vmatmul.msk.f32.vlgmr.msra.gmra.mxu3 %vm247_vm1, %v242_v11 }
 0x191   : > { %v269_v16 = vpop.f32.mrf.mxu1 }
 0x192   : > { %v350_v22 = vsel %vm247_vm1, %v269_v16, -inf }
 0x19b   : > { %v325_v13 = vpop.permute.xlu0 %324 }
 0x19c   : > { %v273_v14 = vpop.permute.xlu1 %272  ;;  %681 = vmatpush.xpose.msk.msrb.mxu1 %vm247_vm1, %v325_v13 }
 0x19d   : > { %677 = vmatpush.xpose.msk.msra.mxu2 %vm247_vm1, %v273_v14 }
 0x19f   : > { %682 = vmatmul.msk.f32.vlgmr.msrb.gmra.mxu1 %vm247_vm1, %v244_v9 }
 0x1a0   : > { %678 = vmatmul.msk.f32.vlgmr.msra.gmra.mxu2 %vm247_vm1, %v240_v10 }
 0x213   : > { %v321_v15 = vpop.f32.mrf.mxu3 }
 0x214   : > { %v356_v17 = vsel %vm247_vm1, %v321_v15, -inf }
 0x215   : > { %357 = vmax.xlane.f32.xlu2 %v356_v17 }
 0x21c   : > { %v347_v18 = vpop.f32.mrf.mxu1 }
 0x21d   : > { %v359_v19 = vsel %vm247_vm1, %v347_v18, -inf }
 0x21e   : > { %360 = vmax.xlane.f32.xlu0 %v359_v19 }
 0x223   : > { %v295_v20 = vpop.f32.mrf.mxu2 }
 0x224   : > { %v353_v21 = vsel %vm247_vm1, %v295_v20, -inf }
 0x225   : > { %354 = vmax.xlane.f32.xlu1 %v353_v21 }
 0x226   : > { %351 = vmax.xlane.f32.xlu0 %v350_v22 }
 0x22d   : > { %412 = vrot.lane.b32.xlu2 %v240_v10, %s919_s22 }
 0x23a   : > { %386 = vrot.lane.b32.xlu0 %v236_v7, %s919_s22 }
 0x23e   : > { %759 = vrot.lane.b32.xlu1 %v758_v23, %s919_s22 }
 0x288   : > { %v358_v24 = vpop.xlane.xlu2 %357 }
 0x289   : > { %v364_v25 = vsub.f32 %v321_v15, %v358_v24 }
 0x28b   : > { %v370_v26 = vmul.f32 1.442695, %v364_v25 }
 0x28d   : > { %764 = vpow2.f32 %v370_v26 }
 0x290   : > { %v413_v27 = vpop.permute.xlu2 %412 }
 0x291   : > { %433 = vmatpush.msrb.mxu3 %v413_v27  ;;  %v361_v28 = vpop.xlane.xlu0 %360 }
 0x292   : > { %v365_v29 = vsub.f32 %v347_v18, %v361_v28 }
 0x293   : > { %v765_v30 = vpop.eup %764 }
 0x294   : > { %v372_v31 = vmul.f32 1.442695, %v365_v29  ;;  %v380_v32 = vsel %vm247_vm1, %v765_v30, 0.0 }
 0x295   : > { %381 = vadd.xlane.f32.xlu1 %v380_v32 }
 0x296   : > { %766 = vpow2.f32 %v372_v31 }
 0x298   : > { %v355_v33 = vpop.xlane.xlu1 %354 }
 0x299   : > { %v363_v34 = vsub.f32 %v295_v20, %v355_v33  ;;  %v352_v35 = vpop.xlane.xlu0 %351 }
 0x29a   : > { %v362_v37 = vsub.f32 %v269_v16, %v352_v35 }
 0x29b   : > { %v368_v36 = vmul.f32 1.442695, %v363_v34 }
 0x29c   : > { %v767_v38 = vpop.eup %766  ;;  %v366_v40 = vmul.f32 1.442695, %v362_v37 }
 0x29d   : > { %768 = vpow2.f32 %v368_v36  ;;  %v383_v39 = vsel %vm247_vm1, %v767_v38, 0.0 }
 0x29e   : > { %384 = vadd.xlane.f32.xlu0 %v383_v39  ;;  %770 = vpow2.f32 %v366_v40 }
 0x2a3   : > { %v769_v41 = vpop.eup %768 }
 0x2a4   : > { %684 = vmatmul.msk.f32.vlgmr.msrb.gmra.mxu3 %vm247_vm1, %v769_v41  ;;  %v377_v42 = vsel %vm247_vm1, %v769_v41, 0.0  ;;  %v771_v43 = vpop.eup %770 }
 0x2a5   : > { %378 = vadd.xlane.f32.xlu2 %v377_v42  ;;  %v374_v45 = vsel %vm247_vm1, %v771_v43, 0.0 }
 0x2ac   : > { %v387_v44 = vpop.permute.xlu0 %386 }
 0x2ad   : > { %375 = vadd.xlane.f32.xlu2 %v374_v45  ;;  %407 = vmatpush.msrb.mxu2 %v387_v44 }
 0x2ae   : > { %683 = vmatmul.msk.f32.vlgmr.msrb.gmra.mxu2 %vm247_vm1, %v771_v43 }
 0x2b0   : > { %v760_v46 = vpop.permute.xlu1 %759 }
 0x2b1   : > { %v762_v47 = vunpack.i.h.bf16 %v760_v46  ;;  %v761_v48 = vunpack.i.l.bf16 %v760_v46 }
 0x2b3   : > { %459 = vmatpush.msrb.mxu0 %v761_v48  ;;  %485 = vmatpush.msra.mxu1 %v762_v47 }
 0x2b4   : > { %685 = vmatmul.msk.f32.vlgmr.msrb.gmra.mxu0 %vm247_vm1, %v765_v30  ;;  %686 = vmatmul.msk.f32.vlgmr.msra.gmra.mxu1 %vm247_vm1, %v767_v38 }
 0x308   : > { %v382_v49 = vpop.xlane.xlu1 %381 }
 0x309   : > { %772 = vrcp.f32 %v382_v49  ;;  %vm523_vm8 = vweird.f32 %v382_v49  ;;  %v529_v10 = vand.u32 2147483648, %v382_v49  ;;  %v527_v12 = vand.u32 2147483647, %v382_v49 }
 0x30b   : > { %v530_v16 = vor.u32 1.1754944e-38, %v529_v10  ;;  %vm528_vm12 = vcmp.eq.f32.partialorder %v527_v12, 8.507059e+37 }
 0x30f   : > { %v773_v52 = vpop.eup %772 }
 0x310   : > { %v519_v54 = vmul.f32 %v773_v52, %v382_v49  ;;  %vm524_vm6 = vweird.f32 %v773_v52 }
 0x311   : > { %v385_v50 = vpop.xlane.xlu0 %384  ;;  %vm525_vm9 = vmor %vm523_vm8, %vm524_vm6 }
 0x312   : > { %774 = vrcp.f32 %v385_v50  ;;  %v520_v58 = vsub.f32 1.0, %v519_v54  ;;  %v543_v11 = vand.u32 2147483648, %v385_v50  ;;  %vm537_vm10 = vweird.f32 %v385_v50 }
 0x313   : > { %v541_v13 = vand.u32 2147483647, %v385_v50 }
 0x314   : > { %v521_v1 = vmul.f32 %v773_v52, %v520_v58  ;;  %v544_v17 = vor.u32 1.1754944e-38, %v543_v11 }
 0x315   : > { %vm542_vm13 = vcmp.eq.f32.partialorder %v541_v13, 8.507059e+37 }
 0x316   : > { %v522_v8 = vadd.f32 %v773_v52, %v521_v1 }
 0x318   : > { %v379_v51 = vpop.xlane.xlu2 %378  ;;  %v775_v53 = vpop.eup %774  ;;  %v526_v14 = vsel %vm525_vm9, %v773_v52, %v522_v8 }
 0x319   : > { %776 = vrcp.f32 %v379_v51  ;;  %v533_v55 = vmul.f32 %v775_v53, %v385_v50  ;;  %v515_v61 = vand.u32 2147483648, %v379_v51  ;;  %v513_v63 = vand.u32 2147483647, %v379_v51 }
 0x31a   : > { %vm509_vm3 = vweird.f32 %v379_v51  ;;  %vm538_vm7 = vweird.f32 %v775_v53  ;;  %v531_v19 = vsel %vm528_vm12, %v530_v16, %v526_v14 }
 0x31b   : > { %v534_v59 = vsub.f32 1.0, %v533_v55  ;;  %v516_v3 = vor.u32 1.1754944e-38, %v515_v61  ;;  %vm514_vm5 = vcmp.eq.f32.partialorder %v513_v63, 8.507059e+37  ;;  %vm539_vm11 = vmor %vm537_vm10, %vm538_vm7 }
 0x31d   : > { %v535_v2 = vmul.f32 %v775_v53, %v534_v59 }
 0x31f   : > { %v777_v56 = vpop.eup %776  ;;  %v536_v9 = vadd.f32 %v775_v53, %v535_v2 }
 0x320   : > { %v505_v57 = vmul.f32 %v777_v56, %v379_v51  ;;  %vm510_vm2 = vweird.f32 %v777_v56  ;;  %v376_v24 = vpop.xlane.xlu2 %375 }
 0x321   : > { %vm511_vm4 = vmor %vm509_vm3, %vm510_vm2  ;;  %v540_v15 = vsel %vm539_vm11, %v775_v53, %v536_v9  ;;  %778 = vrcp.f32 %v376_v24  ;;  %v501_v30 = vand.u32 2147483648, %v376_v24  ;;  %vm495_vm15 = vweird.f32 %v376_v24 }
 0x322   : > { %v506_v60 = vsub.f32 1.0, %v505_v57  ;;  %v545_v21 = vsel %vm542_vm13, %v544_v17, %v540_v15  ;;  %v499_v31 = vand.u32 2147483647, %v376_v24 }
 0x323   : > { %v502_v33 = vor.u32 1.1754944e-38, %v501_v30 }
 0x324   : > { %v507_v62 = vmul.f32 %v777_v56, %v506_v60  ;;  %vm500_vm3 = vcmp.eq.f32.partialorder %v499_v31, 8.507059e+37 }
 0x326   : > { %v508_v0 = vadd.f32 %v777_v56, %v507_v62 }
 0x327   : > { %v435_v5 = vpop.f32.mrf.mxu3  ;;  %v779_v25 = vpop.eup %778 }
 0x328   : > { %v512_v4 = vsel %vm511_vm4, %v777_v56, %v508_v0  ;;  %v491_v26 = vmul.f32 %v779_v25, %v376_v24  ;;  %vm496_vm14 = vweird.f32 %v779_v25  ;;  %vm563_vm4 = vcmask 130048  }
 0x329   : > { %v517_v6 = vsel %vm514_vm5, %v516_v3, %v512_v4  ;;  %vm497_vm2 = vmor %vm495_vm15, %vm496_vm14  ;;  %vm565_vm5 = vcmask 195584  }
 0x32a   : > { %v547_v7 = vmul.f32 %v517_v6, %v435_v5  ;;  %v492_v27 = vsub.f32 1.0, %v491_v26 }
 0x32c   : > { %551 = vrot.lane.b32.xlu1 %v547_v7, %s920_s23  ;;  %v493_v28 = vmul.f32 %v779_v25, %v492_v27 }
 0x32e   : > { %v494_v29 = vadd.f32 %v779_v25, %v493_v28 }
 0x330   : > { %v498_v32 = vsel %vm497_vm2, %v779_v25, %v494_v29 }
 0x331   : > { %v461_v18 = vpop.f32.mrf.mxu0  ;;  %v487_v20 = vpop.f32.mrf.mxu1  ;;  %v503_v35 = vsel %vm500_vm3, %v502_v33, %v498_v32 }
 0x332   : > { %v548_v22 = vmul.f32 %v531_v19, %v461_v18  ;;  %v549_v23 = vmul.f32 %v545_v21, %v487_v20  ;;  %v409_v34 = vpop.f32.mrf.mxu2 }
 0x333   : > { %v546_v37 = vmul.f32 %v503_v35, %v409_v34 }
 0x334   : > { %559 = vrot.lane.b32.xlu0 %v549_v23, %s921_s24  ;;  %555 = vrot.lane.b32.xlu2 %v548_v22, %s922_s25 }
 0x38e   : > { %v556_v39 = vpop.permute.xlu2 %555 }
 0x39e   : > { %v552_v36 = vpop.permute.xlu1 %551 }
 0x39f   : > { %v562_v38 = vsel %vm247_vm1, %v546_v37, %v552_v36 }
 0x3a0   : > { %v564_v41 = vsel %vm563_vm4, %v562_v38, %v556_v39 }
 0x3a6   : > { %v560_v40 = vpop.permute.xlu0 %559 }
 0x3a7   : > { %v566_v42 = vsel %vm565_vm5, %v564_v41, %v560_v40 }
 0x3a8   : > { %567 = vst.msk [vmem:[%s204_s10] sm:$0xff] %vm214_vm0, %v566_v42 }
 0x3a9   : > { %867 = shalt.err (!%p864_p9)
}
 0x3aa   : > { %697 = dma.vmem_to_hbm [thread:$0]  (%p1003_p13), %s582_s11, 128, %s584_s20, %s569_s19  }
 0x3ab PF: > { %s595_s5 = sand.u32 1, %s898_s12   ;;  %p1118_p10 = scmp.ge.s32.totalorder %s910_s15, 2 }
 0x3ac   : > { %s596_s23 = scalar_lea.sflag [#allocation4], %s595_s5 }
 0x3ad   : > { %p708_p11 = pnand %p1118_p10, %p1008_p4 }
 0x3af   : > { %p709_p0 = pneg %p708_p11 }
 0x3b1   : > { %893 = dma.done.wait (%p709_p0), %s596_s23, 128  }
 0x3b2   : > { %895 = vsyncadd (%p709_p0), %s596_s23, 4294967168  ;;  %p17_p2 = scmp.ge.s32.totalorder %s983_s26, 4   ;;  %s1119_s12 = smov %s902_s13 }
 0x3b3   : > { %s1120_s13 = smov %s906_s14  ;;  %s1121_s14 = smov %s995_s29 }
 0x3b4   : > { %s1122_s15 = smov %s983_s26  ;;  %19 = sbr.rel (!%p17_p2) target bundleno = 6 (0x6), region = 81 }
 0x3b9   :  { %602 = vsyncpa [#allocation3], 1 }
 0x3ba   :  { %604 = vsyncpa [#allocation3 + $0x1], 1 }
 0x3bb   :  { %605 = vsyncpa [#allocation6], 1 }
 0x3bc   :  { %606 = vsyncpa [#allocation4], 1 }
 0x3bd   :  { %608 = vsyncpa [#allocation4 + $0x1], 1 }

</bundles_post_ra>
